<compile_context>
chip_gen: v7x
topology: tpu7x:2x2x1
jax: 0.10.0
libtpu: 0.0.40
codegen_flags: <defaults>
</compile_context>

<pallas_src>
import jax
import jax.numpy as jnp
from jax.experimental import pallas as pl
from jax.experimental.pallas import tpu as pltpu


# -----------------------------------------------------------------------------
# Config (mirrors the fields DNNSpeechModel.__init__ reads)
# -----------------------------------------------------------------------------
CONFIG = {
    "n_labels": 12,
    "width": 16,
    "height": 16,
    "dnn1_size": 128,
    "dnn2_size": 64,
    "dropout_prob": 0.5,   # dropout is a no-op in the forward pass at inference
}
BATCH = 8

LANE = 128        # TPU lane width (last-dim padding target)
ROW_ALIGN = 16    # bf16 sublane packing: [16, 128] per vreg
MAX_TILE_M = 512  # rows per batch tile (well under VMEM on v5e/v6e/v7x)


def _round_up(n, m):
    return ((n + m - 1) // m) * m


def _num_tensorcores_per_chip():
    """Crude detection of dual-TensorCore chips (v4 / v5p megacore, v7x)."""
    try:
        kind = jax.devices()[0].device_kind.lower()
    except Exception:
        return 1
    if "v4" in kind or "v5p" in kind or "7" in kind:
        return 2
    return 1


def _plan_tiles(n):
    """Pick (tile_m, n_tiles, n_pad).

    Fewest grid steps possible (per-step overhead ~0.35us dominates this tiny MLP);
    on dual-TC chips use >=2 balanced tiles so both TensorCores get work; cap tiles
    at MAX_TILE_M rows and keep 16-row alignment for bf16 sublane packing.
    """
    n16 = _round_up(max(n, 1), ROW_ALIGN)
    num_tc = _num_tensorcores_per_chip()
    min_tiles = num_tc if n16 >= 2 * ROW_ALIGN * num_tc else 1
    n_tiles = max(min_tiles, pl.cdiv(n16, MAX_TILE_M))
    tile_m = _round_up(pl.cdiv(n16, n_tiles), ROW_ALIGN)
    n_pad = tile_m * n_tiles
    return tile_m, n_tiles, n_pad


# -----------------------------------------------------------------------------
# One-time parameter packing (hoisted out of the forward path; call once per model)
# -----------------------------------------------------------------------------
def pack_model(params, config):
    """Pack weights into one contiguous bf16 slab + a tiny f32 bias block.

    Weight block i is zero-padded to (padded_in_i, slab_w); bias i sits in row i of
    an (8, slab_w) f32 block (exact f32 bias add in-kernel).  Returns a dict holding
    the device arrays plus static slice metadata the kernel closes over.
    """
    d_in = config["width"] * config["height"]  # in_channels == 1
    layers = [
        (params["w1"], params["b1"], True),
        (params["w2"], params["b2"], True),
        (params["wo"], params["bo"], False),
    ]
    in_p = _round_up(d_in, LANE)
    out_ps = [_round_up(w.shape[1], LANE) for w, _, _ in layers]
    slab_w = max(out_ps)

    w_blocks = []
    layer_meta = []
    row = 0
    prev_p = in_p
    for (w, b, relu), out_p in zip(layers, out_ps):
        d_i, d_o = w.shape
        blk = jnp.zeros((prev_p, slab_w), jnp.float32).at[:d_i, :d_o].set(w)
        w_blocks.append(blk)
        layer_meta.append(dict(w_row=row, w_rows=prev_p, out_p=out_p, relu=relu))
        row += prev_p          # prev_p is a multiple of 128 -> offsets stay aligned
        prev_p = out_p

    slab = jnp.concatenate(w_blocks, axis=0).astype(jnp.bfloat16)

    biases = jnp.zeros((_round_up(len(layers), 8), slab_w), jnp.float32)
    for li, (_, b, _) in enumerate(layers):
        bv = b.reshape(-1)
        biases = biases.at[li, : bv.shape[0]].set(bv)

    slab = jax.block_until_ready(slab)
    biases = jax.block_until_ready(biases)
    return dict(
        slab=slab, biases=biases, layer_meta=layer_meta,
        in_p=in_p, out_p=out_ps[-1], d_in=d_in,
        n_labels=params["bo"].shape[-1],
    )


# -----------------------------------------------------------------------------
# Kernel: fused MLP over one batch tile; weight slab + biases resident in VMEM
# -----------------------------------------------------------------------------
def make_fused_mlp_kernel(layer_meta):
    def kernel(x_ref, w_ref, b_ref, o_ref):
        # f32 input tile -> bf16 in-kernel (no wrapper cast/pad pass).
        h = x_ref[...].astype(jnp.bfloat16)                 # (TILE_M, IN_P)
        out = None
        for li, m in enumerate(layer_meta):
            w = w_ref[pl.ds(m["w_row"], m["w_rows"]), pl.ds(0, m["out_p"])]
            b = b_ref[pl.ds(li, 1), pl.ds(0, m["out_p"])]   # (1, out_p) f32, exact bias
            acc = jnp.dot(h, w, preferred_element_type=jnp.float32) + b
            if m["relu"]:
                acc = jnp.maximum(acc, 0.0)                 # Dropout == identity
                h = acc.astype(jnp.bfloat16)
            else:
                out = acc
        o_ref[...] = out.astype(o_ref.dtype)                # lane-dense (TILE_M, 128)
    return kernel


# -----------------------------------------------------------------------------
# Wrapper
# -----------------------------------------------------------------------------
def dnn_speech_model_forward(x_nchw, packed):
    """DNNSpeechModel forward via a single fused pallas_call.

    x_nchw: (N, 1, W, H) float32 — same layout PyTorch would receive.
    packed: output of pack_model() (precomputed once per model).
    """
    n = x_nchw.shape[0]
    d_in, in_p = packed["d_in"], packed["in_p"]
    # torch: x = x.view(x.size(0), -1)  (row-major flatten — identical in JAX)
    x2d = x_nchw.reshape(n, -1)
    assert x2d.shape[1] == d_in

    tile_m, n_tiles, n_pad = _plan_tiles(n)

    if n_pad == n and in_p == d_in:
        xk = x2d                                  # zero-copy path (common case)
    else:
        # Ragged batch remainder (or non-128 d_in): pad in f32; zero rows flow
        # harmlessly through bias+ReLU and are sliced off below.
        xk = jnp.zeros((n_pad, in_p), x2d.dtype).at[:n, :d_in].set(x2d)

    out = pl.pallas_call(
        make_fused_mlp_kernel(packed["layer_meta"]),
        out_shape=jax.ShapeDtypeStruct((n_pad, packed["out_p"]), jnp.float32),
        grid=(n_tiles,),
        in_specs=[
            pl.BlockSpec((tile_m, in_p), lambda i: (i, 0)),
            pl.BlockSpec(packed["slab"].shape, lambda i: (0, 0)),    # resident weights
            pl.BlockSpec(packed["biases"].shape, lambda i: (0, 0)),  # resident biases
        ],
        out_specs=pl.BlockSpec((tile_m, packed["out_p"]), lambda i: (i, 0)),
        compiler_params=pltpu.CompilerParams(
            dimension_semantics=("parallel",),
        ),
    )(xk, packed["slab"], packed["biases"])

    # Slice away batch padding and the lane padding of the n_labels output.
    return out[:n, :packed["n_labels"]]


# -----------------------------------------------------------------------------
# Params + reference
# -----------------------------------------------------------------------------
def init_params(config, key):
    """Deterministic synthetic parameter init with the shapes __init__ implies."""
    d_in = config["width"] * config["height"]  # in_channels == 1
    sizes = []
    count = 1
    last = d_in
    while f"dnn{count}_size" in config:
        sizes.append((last, config[f"dnn{count}_size"]))
        last = config[f"dnn{count}_size"]
        count += 1
    out_in, out_out = last, config["n_labels"]

    keys = jax.random.split(key, 2 * (len(sizes) + 1))
    params = {}
    (i1, o1), (i2, o2) = sizes
    params["w1"] = jax.random.normal(keys[0], (i1, o1), jnp.float32) * 0.05
    params["b1"] = jax.random.normal(keys[1], (1, o1), jnp.float32) * 0.05
    params["w2"] = jax.random.normal(keys[2], (i2, o2), jnp.float32) * 0.05
    params["b2"] = jax.random.normal(keys[3], (1, o2), jnp.float32) * 0.05
    params["wo"] = jax.random.normal(keys[4], (out_in, out_out), jnp.float32) * 0.05
    params["bo"] = jax.random.normal(keys[5], (1, out_out), jnp.float32) * 0.05
    return params


def reference_forward(x_nchw, params):
    """Pure-JAX reference matching the kernel's bf16-operand / f32-acc / f32-bias math."""
    x = x_nchw.reshape(x_nchw.shape[0], -1).astype(jnp.bfloat16)

    def dense(h, w, b):
        y = jnp.dot(h, w.astype(jnp.bfloat16), preferred_element_type=jnp.float32)
        return y + b.astype(jnp.float32)

    h1 = jnp.maximum(dense(x, params["w1"], params["b1"]), 0.0)
    h2 = jnp.maximum(dense(h1.astype(jnp.bfloat16), params["w2"], params["b2"]), 0.0)
    return dense(h2.astype(jnp.bfloat16), params["wo"], params["bo"])


if __name__ == "__main__":
    key = jax.random.PRNGKey(0)
    k_x, k_p = jax.random.split(key)

    # TODO(synk): nn.Dropout is stochastic only in training mode; the kernel
    # implements the (deterministic) inference-mode identity behavior.
    params = init_params(CONFIG, k_p)
    packed = pack_model(params, CONFIG)   # one-time packing, reused across calls

    # Small-batch path (single tile, batch padded to 16 rows inside the wrapper).
    x = jax.random.normal(
        k_x, (BATCH, 1, CONFIG["width"], CONFIG["height"]), jnp.float32
    )
    out = jax.block_until_ready(dnn_speech_model_forward(x, packed))
    ref = reference_forward(x, params)
    assert out.shape == (BATCH, CONFIG["n_labels"])
    assert jnp.allclose(out, ref, atol=1e-2, rtol=1e-2)

    # Batched path (zero-copy input, 1-2 balanced tiles depending on chip generation).
    xb = jax.random.normal(
        jax.random.PRNGKey(1), (256, 1, CONFIG["width"], CONFIG["height"]), jnp.float32
    )
    out_b = jax.block_until_ready(dnn_speech_model_forward(xb, packed))
    ref_b = reference_forward(xb, params)
    assert out_b.shape == (256, CONFIG["n_labels"])
    assert jnp.allclose(out_b, ref_b, atol=1e-2, rtol=1e-2)

    print("KERNEL_OK")
</pallas_src>

<mosaic_0001>
module attributes {stable_mosaic.version = 11 : i64} {
  func.func @kernel(%arg0: i32, %arg1: memref<16x256xf32, #tpu.memory_space<vmem>>, %arg2: memref<512x128xbf16, #tpu.memory_space<vmem>>, %arg3: memref<8x128xf32, #tpu.memory_space<vmem>>, %arg4: memref<16x128xf32, #tpu.memory_space<vmem>>) attributes {dimension_semantics = [#tpu.dimension_semantics<parallel>], iteration_bounds = array<i64: 1>, scalar_prefetch = 0 : i64, scratch_operands = 0 : i64, tpu.core_type = #tpu.core_type<tc>, window_params = [{transform_indices = @transform_0, window_bounds = array<i64: 16, 256>}, {pipeline_mode = #tpu.pipeline_mode<synchronous>, transform_indices = @transform_1, window_bounds = array<i64: 512, 128>}, {pipeline_mode = #tpu.pipeline_mode<synchronous>, transform_indices = @transform_2, window_bounds = array<i64: 8, 128>}, {transform_indices = @transform_3, window_bounds = array<i64: 16, 128>}]} {
    %c0 = arith.constant 0 : index
    %c0_0 = arith.constant 0 : index
    %0 = vector.load %arg1[%c0, %c0_0] : memref<16x256xf32, #tpu.memory_space<vmem>>, vector<16x256xf32>
    %1 = arith.truncf %0 : vector<16x256xf32> to vector<16x256xbf16>
    %c0_1 = arith.constant 0 : index
    %c0_2 = arith.constant 0 : index
    %2 = vector.load %arg2[%c0_1, %c0_2] : memref<512x128xbf16, #tpu.memory_space<vmem>>, vector<256x128xbf16>
    %c0_3 = arith.constant 0 : index
    %c0_4 = arith.constant 0 : index
    %3 = vector.load %arg3[%c0_3, %c0_4] : memref<8x128xf32, #tpu.memory_space<vmem>>, vector<1x128xf32>
    %cst = arith.constant dense<0.000000e+00> : vector<16x128xf32>
    %4 = tpu.matmul %1, %2, %cst {dimension_numbers = #tpu.dot_dimension_numbers<[1], [0], [0], [1], [0, 0, 1, 1], [], []>} : vector<16x256xbf16>, vector<256x128xbf16>, vector<16x128xf32> -> vector<16x128xf32>
    %5 = vector.broadcast %3 : vector<1x128xf32> to vector<16x128xf32>
    %6 = arith.addf %4, %5 : vector<16x128xf32>
    %cst_5 = arith.constant 0.000000e+00 : f32
    %7 = vector.broadcast %cst_5 : f32 to vector<16x128xf32>
    %8 = arith.maximumf %6, %7 : vector<16x128xf32>
    %9 = arith.truncf %8 : vector<16x128xf32> to vector<16x128xbf16>
    %c256 = arith.constant 256 : index
    %c0_6 = arith.constant 0 : index
    %10 = vector.load %arg2[%c256, %c0_6] : memref<512x128xbf16, #tpu.memory_space<vmem>>, vector<128x128xbf16>
    %c1 = arith.constant 1 : index
    %c0_7 = arith.constant 0 : index
    %11 = vector.load %arg3[%c1, %c0_7] : memref<8x128xf32, #tpu.memory_space<vmem>>, vector<1x128xf32>
    %cst_8 = arith.constant dense<0.000000e+00> : vector<16x128xf32>
    %12 = tpu.matmul %9, %10, %cst_8 {dimension_numbers = #tpu.dot_dimension_numbers<[1], [0], [0], [1], [0, 0, 1, 1], [], []>} : vector<16x128xbf16>, vector<128x128xbf16>, vector<16x128xf32> -> vector<16x128xf32>
    %13 = vector.broadcast %11 : vector<1x128xf32> to vector<16x128xf32>
    %14 = arith.addf %12, %13 : vector<16x128xf32>
    %cst_9 = arith.constant 0.000000e+00 : f32
    %15 = vector.broadcast %cst_9 : f32 to vector<16x128xf32>
    %16 = arith.maximumf %14, %15 : vector<16x128xf32>
    %17 = arith.truncf %16 : vector<16x128xf32> to vector<16x128xbf16>
    %c384 = arith.constant 384 : index
    %c0_10 = arith.constant 0 : index
    %18 = vector.load %arg2[%c384, %c0_10] : memref<512x128xbf16, #tpu.memory_space<vmem>>, vector<128x128xbf16>
    %c2 = arith.constant 2 : index
    %c0_11 = arith.constant 0 : index
    %19 = vector.load %arg3[%c2, %c0_11] : memref<8x128xf32, #tpu.memory_space<vmem>>, vector<1x128xf32>
    %cst_12 = arith.constant dense<0.000000e+00> : vector<16x128xf32>
    %20 = tpu.matmul %17, %18, %cst_12 {dimension_numbers = #tpu.dot_dimension_numbers<[1], [0], [0], [1], [0, 0, 1, 1], [], []>} : vector<16x128xbf16>, vector<128x128xbf16>, vector<16x128xf32> -> vector<16x128xf32>
    %21 = vector.broadcast %19 : vector<1x128xf32> to vector<16x128xf32>
    %22 = arith.addf %20, %21 : vector<16x128xf32>
    %c0_13 = arith.constant 0 : index
    %c0_14 = arith.constant 0 : index
    %23 = vector.load %arg4[%c0_13, %c0_14] : memref<16x128xf32, #tpu.memory_space<vmem>>, vector<16x128xf32>
    tpu.vector_store %arg4[%c0_13, %c0_14], %22 {strides = array<i32>} : memref<16x128xf32, #tpu.memory_space<vmem>>, vector<16x128xf32>,
    return
  }
  func.func @transform_0(%arg0: i32) -> (i32, i32) {
    %c0_i32 = arith.constant 0 : i32
    %c0_i32_0 = arith.constant 0 : i32
    return %arg0, %c0_i32 : i32, i32
  }
  func.func @transform_1(%arg0: i32) -> (i32, i32) {
    %c0_i32 = arith.constant 0 : i32
    %c0_i32_0 = arith.constant 0 : i32
    %c0_i32_1 = arith.constant 0 : i32
    return %c0_i32, %c0_i32_0 : i32, i32
  }
  func.func @transform_2(%arg0: i32) -> (i32, i32) {
    %c0_i32 = arith.constant 0 : i32
    %c0_i32_0 = arith.constant 0 : i32
    %c0_i32_1 = arith.constant 0 : i32
    return %c0_i32, %c0_i32_0 : i32, i32
  }
  func.func @transform_3(%arg0: i32) -> (i32, i32) {
    %c0_i32 = arith.constant 0 : i32
    %c0_i32_0 = arith.constant 0 : i32
    return %arg0, %c0_i32 : i32, i32
  }
}

</mosaic_0001>

<bundles_post_ra>
// kernel: tpu_custom_call.1
= control target key start
LH: loop header
LB: loop body
LE: loop exit
PB: predicated region body
PF: predicated region fallthrough
CT: control target
= control target key end

     0   :  { %8 = vsyncpa [#allocation3], 0  ;;  %s832_s0 = inlined_call_operand.hbm [shape: f32[16,256], index: 0, kind: input, shape index: {}]   ;;  %s833_s1 = inlined_call_operand.hbm [shape: bf16[512,128], index: 1, kind: input, shape index: {}]   ;;  %s834_s2 = inlined_call_operand.hbm [shape: f32[8,128], index: 2, kind: input, shape index: {}]   ;;  %s835_s3 = inlined_call_operand.hbm [shape: f32[16,128], index: 3, kind: output, shape index: {}]  }
   0x1   :  { %9 = vsyncpa [#allocation6], 0 }
   0x2   :  { %10 = vsyncpa [#allocation4], 0  ;;  %s734_s12 = smov [#allocation5]   ;;  %s640_s16 = scalar_lea.hbm %s833_s1, 4096 }
   0x3   :  { %s28_s13 = sshll.u32 %s734_s12, 4  ;;  %p641_p0 = scmp.ne.s32.totalorder %s833_s1, %s640_s16  ;;  %s29_s13 = int_to_ptr.vmem [resolvable:$true] %s28_s13 }
   0x4   :  { %p644_p1 = scmp.lt.u32.totalorder %s640_s16, %s833_s1 }
   0x6   :  { %p646_p2 = pnand %p644_p1, %p641_p0 }
   0x8   :  { %649 = shalt.err (!%p646_p2)
}
   0x9   :  { %s650_s21 = scalar_lea.vmem %s29_s13, 4096  ;;  %p655_p4 = scmp.lt.s32.totalorder %s29_s13, %s29_s13 }
   0xa   :  { %p651_p3 = scmp.ne.s32.totalorder %s29_s13, %s650_s21  ;;  %p656_p5 = scmp.lt.s32.totalorder %s650_s21, %s650_s21 }
   0xc   :  { %p657_p6 = por %p656_p5, %p655_p4 }
   0xe   :  { %p658_p7 = pnand %p657_p6, %p651_p3 }
  0x10   :  { %661 = shalt.err (!%p658_p7)
}
  0x11   :  { %s735_s22 = smov 64   ;;  %s736_s23 = smov 4  }
  0x12   :  { %34 = dma.hbm_to_vmem [thread:$0]  %s833_s1, 4096, %s29_s13, [#allocation6], %s735_s22, %s735_s22, %s736_s23  }
  0x13   :  { %s737_s26 = smov [#allocation2]   ;;  %s662_s30 = scalar_lea.hbm %s832_s0, 512 }
  0x14   :  { %s16_s27 = sshll.u32 %s737_s26, 4  ;;  %p663_p8 = scmp.ne.s32.totalorder %s832_s0, %s662_s30  ;;  %s17_s27 = int_to_ptr.vmem [resolvable:$true] %s16_s27 }
  0x15   :  { %p666_p9 = scmp.lt.u32.totalorder %s662_s30, %s832_s0 }
  0x17   :  { %p668_p10 = pnand %p666_p9, %p663_p8 }
  0x19   :  { %671 = shalt.err (!%p668_p10)
}
  0x1a   :  { %s672_s8 = scalar_lea.vmem %s17_s27, 512  ;;  %p677_p12 = scmp.lt.s32.totalorder %s17_s27, %s17_s27 }
  0x1b   :  { %p673_p11 = scmp.ne.s32.totalorder %s17_s27, %s672_s8  ;;  %p678_p13 = scmp.lt.s32.totalorder %s672_s8, %s672_s8 }
  0x1d   :  { %p679_p0 = por %p678_p13, %p677_p12 }
  0x1f   :  { %p680_p1 = pnand %p679_p0, %p673_p11 }
  0x21   :  { %683 = shalt.err (!%p680_p1)
}
  0x22   :  { %s738_s1 = smov 256   ;;  %s739_s9 = smov 16  }
  0x23   :  { %22 = dma.hbm_to_vmem [thread:$0]  %s832_s0, 512, %s17_s27, [#allocation3], %s738_s1, %s738_s1, %s739_s9  }
  0x24   :  { %s740_s12 = smov [#allocation7]   ;;  %s684_s16 = scalar_lea.hbm %s834_s2, 128 }
  0x25   :  { %s41_s13 = sshll.u32 %s740_s12, 4  ;;  %p685_p2 = scmp.ne.s32.totalorder %s834_s2, %s684_s16  ;;  %s42_s13 = int_to_ptr.vmem [resolvable:$true] %s41_s13 }
  0x26   :  { %p688_p3 = scmp.lt.u32.totalorder %s684_s16, %s834_s2 }
  0x28   :  { %p690_p4 = pnand %p688_p3, %p685_p2 }
  0x2a   :  { %693 = shalt.err (!%p690_p4)
}
  0x2b   :  { %s694_s21 = scalar_lea.vmem %s42_s13, 128  ;;  %p699_p6 = scmp.lt.s32.totalorder %s42_s13, %s42_s13 }
  0x2c   :  { %p695_p5 = scmp.ne.s32.totalorder %s42_s13, %s694_s21  ;;  %p700_p7 = scmp.lt.s32.totalorder %s694_s21, %s694_s21 }
  0x2e   :  { %p701_p8 = por %p700_p7, %p699_p6 }
  0x30   :  { %p702_p9 = pnand %p701_p8, %p695_p5 }
  0x32   :  { %705 = shalt.err (!%p702_p9)
}
  0x33   :  { %44 = dma.hbm_to_vmem [thread:$0]  %s834_s2, 128, %s42_s13, [#allocation6]  }
  0x34   :  { %728 = dma.done.wait [#allocation3], 512  }
  0x35   :  { %729 = vsyncadd [#allocation3], 4294966784 }
  0x36   :  { %730 = dma.done.wait [#allocation6], 4224  }
  0x37   :  { %731 = vsyncadd [#allocation6], 4294963072  ;;  %v741_v0 = vmov 0.0   ;;  %v608_v1 = vld [vmem:[#allocation5 + $0x40] sm:$0xff]   ;;  %v610_v3 = vld [vmem:[#allocation5 + $0x48] sm:$0xff]   ;;  %vm742_vm0 = vmmov 0  }
  0x38   :  { %556 = vmatprep.subr.bf16.mxu1 %v741_v0  ;;  %v609_v2 = vld [vmem:[#allocation5] sm:$0xff]   ;;  %516 = vmatprep.subr.bf16.mxu0 %v608_v1  ;;  %v611_v4 = vld [vmem:[#allocation5 + $0x8] sm:$0xff]   ;;  %v612_v5 = vld [vmem:[#allocation5 + $0x50] sm:$0xff]   ;;  %s743_s2 = smov [#allocation8]  }
  0x39   :  { %517 = vmatpush3.bf16.msra.mxu0 %v609_v2  ;;  %v613_v6 = vld [vmem:[#allocation5 + $0x10] sm:$0xff]   ;;  %v614_v7 = vld [vmem:[#allocation5 + $0x58] sm:$0xff]   ;;  %v616_v9 = vld [vmem:[#allocation5 + $0x60] sm:$0xff]   ;;  %572 = vmatprep.mubr.msk.bf16.mxu1 %vm742_vm0, %v741_v0  ;;  %s468_s23 = sshll.u32 %s743_s2, 4  ;;  %s469_s23 = int_to_ptr.vmem [resolvable:$true] %s468_s23 }
  0x3a   :  { %518 = vmatprep.subr.bf16.mxu0 %v610_v3  ;;  %v615_v8 = vld [vmem:[#allocation5 + $0x18] sm:$0xff]   ;;  %v617_v10 = vld [vmem:[#allocation5 + $0x20] sm:$0xff]   ;;  %v618_v11 = vld [vmem:[#allocation5 + $0x68] sm:$0xff]   ;;  %s706_s24 = scalar_lea.vmem %s469_s23, 256  ;;  %p711_p11 = scmp.lt.s32.totalorder %s469_s23, %s469_s23 }
  0x3b   :  { %v56_v12 = vld [vmem:[#allocation2 + $0x8] sm:$0xff]  ;;  %v58_v13 = vld [vmem:[#allocation2 + $0x18] sm:$0xff]  ;;  %v624_v16 = vld [vmem:[#allocation5 + $0x80] sm:$0xff]   ;;  %p707_p10 = scmp.ne.s32.totalorder %s469_s23, %s706_s24  ;;  %p712_p12 = scmp.lt.s32.totalorder %s706_s24, %s706_s24 }
  0x3c   :  { %v619_v14 = vld [vmem:[#allocation5 + $0x28] sm:$0xff]   ;;  %v60_v15 = vpack.c.bf16 %v58_v13, %v56_v12  ;;  %v620_v17 = vld [vmem:[#allocation5 + $0x70] sm:$0xff]   ;;  %557 = vmatpush3.bf16.msra.mxu1 %v624_v16  ;;  %v622_v20 = vld [vmem:[#allocation5 + $0x78] sm:$0xff]  }
  0x3d   :  { %519 = vmatpush3.bf16.msra.mxu0 %v611_v4  ;;  %v625_v18 = vld [vmem:[#allocation5 + $0x88] sm:$0xff]   ;;  %v621_v19 = vld [vmem:[#allocation5 + $0x30] sm:$0xff]   ;;  %558 = vmatprep.subr.bf16.mxu1 %v741_v0  ;;  %v623_v22 = vld [vmem:[#allocation5 + $0x38] sm:$0xff]   ;;  %p713_p13 = por %p712_p12, %p711_p11 }
  0x3e   :  { %520 = vmatprep.subr.bf16.mxu0 %v612_v5  ;;  %226 = vmatprep.mubr.bf16.mxu0 %v60_v15  ;;  %v626_v21 = vld [vmem:[#allocation5 + $0x90] sm:$0xff]   ;;  %v55_v23 = vld [vmem:[#allocation2] sm:$0xff]  ;;  %v627_v25 = vld [vmem:[#allocation5 + $0x98] sm:$0xff]  }
  0x3f   :  { %v57_v24 = vld [vmem:[#allocation2 + $0x10] sm:$0xff]  ;;  %v628_v27 = vld [vmem:[#allocation5 + $0xa0] sm:$0xff]   ;;  %v629_v28 = vld [vmem:[#allocation5 + $0xa8] sm:$0xff]   ;;  %p714_p0 = pnand %p713_p13, %p707_p10 }
  0x40   :  { %559 = vmatpush3.bf16.msra.mxu1 %v625_v18  ;;  %v59_v26 = vpack.c.bf16 %v57_v24, %v55_v23  ;;  %v630_v29 = vld [vmem:[#allocation5 + $0xb0] sm:$0xff]   ;;  %v631_v30 = vld [vmem:[#allocation5 + $0xb8] sm:$0xff]   ;;  %v632_v31 = vld [vmem:[#allocation5 + $0xc0] sm:$0xff]  }
  0x41   :  { %521 = vmatpush3.bf16.msra.mxu0 %v613_v6  ;;  %560 = vmatprep.subr.bf16.mxu1 %v741_v0  ;;  %v633_v32 = vld [vmem:[#allocation5 + $0xc8] sm:$0xff]   ;;  %v634_v33 = vld [vmem:[#allocation5 + $0xd0] sm:$0xff]   ;;  %v635_v34 = vld [vmem:[#allocation5 + $0xd8] sm:$0xff]  }
  0x42   :  { %522 = vmatprep.subr.bf16.mxu0 %v614_v7  ;;  %v636_v35 = vld [vmem:[#allocation5 + $0xe0] sm:$0xff]   ;;  %v637_v36 = vld [vmem:[#allocation5 + $0xe8] sm:$0xff]   ;;  %v638_v49 = vld [vmem:[#allocation5 + $0xf0] sm:$0xff]  }
  0x43   :  { %v481_v38 = vld [vmem:[#allocation7] ss:$0 sm:$0xff]  ;;  %v639_v50 = vld [vmem:[#allocation5 + $0xf8] sm:$0xff]   ;;  %v498_v51 = vld [vmem:[#allocation7 + $0x1] ss:$0 sm:$0xff] }
  0x44   :  { %561 = vmatpush3.bf16.msra.mxu1 %v626_v21  ;;  %v507_v61 = vld [vmem:[#allocation7 + $0x2] ss:$0 sm:$0xff] }
  0x45   :  { %523 = vmatpush3.bf16.msra.mxu0 %v615_v8  ;;  %562 = vmatprep.subr.bf16.mxu1 %v741_v0 }
  0x46   :  { %524 = vmatprep.subr.bf16.mxu0 %v616_v9 }
  0x48   :  { %563 = vmatpush3.bf16.msra.mxu1 %v627_v25 }
  0x49   :  { %525 = vmatpush3.bf16.msra.mxu0 %v617_v10  ;;  %564 = vmatprep.subr.bf16.mxu1 %v741_v0 }
  0x4a   :  { %526 = vmatprep.subr.bf16.mxu0 %v618_v11 }
  0x4c   :  { %565 = vmatpush3.bf16.msra.mxu1 %v628_v27 }
  0x4d   :  { %527 = vmatpush3.bf16.msra.mxu0 %v619_v14  ;;  %566 = vmatprep.subr.bf16.mxu1 %v741_v0 }
  0x4e   :  { %528 = vmatprep.subr.bf16.mxu0 %v620_v17 }
  0x50   :  { %567 = vmatpush3.bf16.msra.mxu1 %v629_v28 }
  0x51   :  { %529 = vmatpush3.bf16.msra.mxu0 %v621_v19  ;;  %568 = vmatprep.subr.bf16.mxu1 %v741_v0 }
  0x52   :  { %530 = vmatprep.subr.bf16.mxu0 %v622_v20 }
  0x54   :  { %569 = vmatpush3.bf16.msra.mxu1 %v630_v29 }
  0x55   :  { %531 = vmatpush3.bf16.msra.mxu0 %v623_v22  ;;  %570 = vmatprep.subr.bf16.mxu1 %v741_v0 }
  0x56   :  { %576 = vmatprep.subr.bf16.mxu0 %v741_v0 }
  0x58   :  { %227 = vmatmul.mubr.bf16.vlgmr.msra.gmra.mrb[0].mxu0 %v59_v26  ;;  %571 = vmatpush3.bf16.msra.mxu1 %v631_v30 }
  0x59   :  { %592 = vmatprep.mubr.msk.bf16.mxu0 %vm742_vm0, %v741_v0  ;;  %577 = vmatpush3.bf16.msra.mxu0 %v632_v31 }
  0x5a   :  { %578 = vmatprep.subr.bf16.mxu0 %v741_v0 }
  0x5d   :  { %579 = vmatpush3.bf16.msra.mxu0 %v633_v32 }
  0x5e   :  { %580 = vmatprep.subr.bf16.mxu0 %v741_v0 }
  0x61   :  { %581 = vmatpush3.bf16.msra.mxu0 %v634_v33 }
  0x62   :  { %582 = vmatprep.subr.bf16.mxu0 %v741_v0 }
  0x65   :  { %583 = vmatpush3.bf16.msra.mxu0 %v635_v34 }
  0x66   :  { %584 = vmatprep.subr.bf16.mxu0 %v741_v0 }
  0x69   :  { %585 = vmatpush3.bf16.msra.mxu0 %v636_v35 }
  0x6a   :  { %586 = vmatprep.subr.bf16.mxu0 %v741_v0 }
  0x6d   :  { %587 = vmatpush3.bf16.msra.mxu0 %v637_v36 }
  0x6e   :  { %588 = vmatprep.subr.bf16.mxu0 %v741_v0 }
  0x71   :  { %589 = vmatpush3.bf16.msra.mxu0 %v638_v49 }
  0x72   :  { %590 = vmatprep.subr.bf16.mxu0 %v741_v0 }
  0x75   :  { %591 = vmatpush3.bf16.msra.mxu0 %v639_v50 }
 0x12b   :  { %v532_v37 = vpop.f32.mrb[0].mxu0 }
 0x12c   :  { %v533_v39 = vpop.f32.mrb[1].mxu0 }
 0x12d   :  { %v534_v40 = vadd.f32 %v533_v39, %v532_v37  ;;  %v535_v41 = vpop.f32.mrb[2].mxu0 }
 0x12e   :  { %v536_v42 = vpop.f32.mrb[3].mxu0 }
 0x12f   :  { %v229_v43 = vadd.f32 %v534_v40, %v481_v38  ;;  %v537_v44 = vadd.f32 %v536_v42, %v535_v41 }
 0x131   :  { %v232_v45 = vadd.f32 %v537_v44, %v481_v38  ;;  %v235_v46 = vmax.f32 %v229_v43, 0.0 }
 0x133   :  { %v236_v47 = vmax.f32 %v232_v45, 0.0 }
 0x135   :  { %v237_v48 = vpack.c.bf16 %v236_v47, %v235_v46 }
 0x137   :  { %573 = vmatmul.mubr.bf16.vlgmr.msra.gmra.mrb[0].mxu1 %v237_v48 }
 0x20a   :  { %v341_v52 = vpop.f32.mrb[0].mxu1 }
 0x20b   :  { %v342_v53 = vadd.f32 %v498_v51, %v341_v52  ;;  %v574_v54 = vpop.f32.mrb[1].mxu1 }
 0x20c   :  { %v344_v55 = vpop.f32.mrb[2].mxu1 }
 0x20d   :  { %v345_v56 = vadd.f32 %v498_v51, %v344_v55  ;;  %v575_v57 = vpop.f32.mrb[3].mxu1  ;;  %v348_v58 = vmax.f32 %v342_v53, 0.0 }
 0x20f   :  { %v349_v59 = vmax.f32 %v345_v56, 0.0 }
 0x211   :  { %v350_v60 = vpack.c.bf16 %v349_v59, %v348_v58 }
 0x213   :  { %593 = vmatmul.mubr.bf16.vlgmr.msra.gmra.mrb[4].mxu0 %v350_v60 }
 0x2e6   :  { %v454_v62 = vpop.f32.mrb[4].mxu0 }
 0x2e7   :  { %v455_v63 = vadd.f32 %v507_v61, %v454_v62  ;;  %v594_v1 = vpop.f32.mrb[5].mxu0 }
 0x2e8   :  { %v457_v0 = vpop.f32.mrb[6].mxu0 }
 0x2e9   :  { %461 = vst [vmem:[#allocation8] sm:$0xff] %v455_v63  ;;  %v458_v2 = vadd.f32 %v507_v61, %v457_v0  ;;  %v595_v3 = vpop.f32.mrb[7].mxu0 }
 0x2eb   :  { %462 = vst [vmem:[#allocation8 + $0x8] sm:$0xff] %v458_v2 }
 0x2ec   :  { %717 = shalt.err (!%p714_p0)
}
 0x2ed   :  { %s718_s27 = scalar_lea.hbm %s835_s3, 256 }
 0x2ee   :  { %p719_p1 = scmp.ne.s32.totalorder %s835_s3, %s718_s27  ;;  %p722_p2 = scmp.lt.u32.totalorder %s718_s27, %s835_s3 }
 0x2f0   :  { %p724_p3 = pnand %p722_p2, %p719_p1 }
 0x2f2   :  { %727 = shalt.err (!%p724_p3)
}
 0x2f3   :  { %s744_s5 = smov 128   ;;  %s745_s6 = smov 8  }
 0x2f4   :  { %474 = dma.vmem_to_hbm [thread:$0]  %s469_s23, 256, %s835_s3, [#allocation4], %s744_s5, %s744_s5, %s745_s6  }
 0x2f5   :  { %732 = dma.done.wait [#allocation4], 256  }
 0x2f6   :  { %733 = vsyncadd [#allocation4], 4294967040 }
 0x2f7   :  { %478 = vsyncpa [#allocation3], 1 }
 0x2f8   :  { %479 = vsyncpa [#allocation6], 1 }
 0x2f9   :  { %480 = vsyncpa [#allocation4], 1 }

</bundles_post_ra>
